<compile_context>
chip_gen: v6e
topology: v6e:2x2x1
jax: 0.10.0
libtpu: 0.0.40
codegen_flags: <defaults>
</compile_context>

<pallas_src>
import jax
import jax.numpy as jnp
from jax.experimental import pallas as pl
from jax.experimental.pallas import tpu as pltpu


def conv2d_pallas(x_nchw, w_oihw, bias):
    """Valid (no-pad) stride-1 Conv2d + bias, computed in a Pallas TPU kernel."""
    B, C_in, H, W = x_nchw.shape
    C_out, C_in_w, KH, KW = w_oihw.shape
    assert C_in == C_in_w
    H_out = H - KH + 1
    W_out = W - KW + 1
    M = H_out * W_out                      # output pixels per image (196)
    K = KH * KW * C_in                     # contraction size (27)
    K_pad = ((K + 1 + 7) // 8) * 8         # +1 bias row, rounded to sublane (32)

    # ---- wrapper-side im2col (XLA layout work, done once per call) ----
    x_nhwc = jnp.transpose(x_nchw, (0, 2, 3, 1))               # (B, H, W, Cin)
    taps = [x_nhwc[:, kh:kh + H_out, kw:kw + W_out, :]
            for kh in range(KH) for kw in range(KW)]           # (B,Ho,Wo,Cin) each
    # (B, Ho, Wo, KH*KW, Cin) -> (B, M, K), K ordered (kh, kw, cin)
    patches = jnp.stack(taps, axis=3).reshape(B, M, K)
    patches = jnp.transpose(patches, (0, 2, 1))                # (B, K, M)
    patches = jnp.concatenate(
        [patches,
         jnp.ones((B, 1, M), patches.dtype),                   # bias row
         jnp.zeros((B, K_pad - K - 1, M), patches.dtype)],     # pad to K_pad
        axis=1)                                                # (B, K_pad, M)

    # ---- weights with bias folded in, same (kh, kw, cin) ordering ----
    w_mat = jnp.transpose(w_oihw, (0, 2, 3, 1)).reshape(C_out, K)   # (Cout, K)
    w_mat = jnp.concatenate(
        [w_mat,
         bias.reshape(C_out, 1),
         jnp.zeros((C_out, K_pad - K - 1), w_mat.dtype)],
        axis=1)                                                     # (Cout, K_pad)

    def kernel(w_ref, p_ref, o_ref):
        # w_ref: (Cout, K_pad)   p_ref: (1, K_pad, M)   o_ref: (1, Cout, M)
        o_ref[0] = jnp.dot(w_ref[...], p_ref[0],
                           preferred_element_type=jnp.float32).astype(o_ref.dtype)

    out = pl.pallas_call(
        kernel,
        out_shape=jax.ShapeDtypeStruct((B, C_out, M), x_nchw.dtype),
        grid=(B,),
        in_specs=[
            pl.BlockSpec((C_out, K_pad), lambda b_: (0, 0)),
            pl.BlockSpec((1, K_pad, M), lambda b_: (b_, 0, 0)),
        ],
        out_specs=pl.BlockSpec((1, C_out, M), lambda b_: (b_, 0, 0)),
        compiler_params=pltpu.CompilerParams(
            dimension_semantics=("parallel",)),
    )(w_mat, patches)

    # (B, Cout, Ho*Wo) is already NCHW ordering — just reshape.
    return out.reshape(B, C_out, H_out, W_out)


if __name__ == "__main__":
    key = jax.random.PRNGKey(0)
    kx, kw, kb = jax.random.split(key, 3)

    # Shapes implied by the module: Conv2d(3 -> 32, 3x3). Small spatial = 16.
    B, C_in, H, W = 2, 3, 16, 16
    C_out, Kk = 32, 3

    x = jax.random.normal(kx, (B, C_in, H, W), dtype=jnp.float32)

    # Deterministic parameter init (same shapes / bound style as nn.Conv2d).
    fan_in = C_in * Kk * Kk
    bound = 1.0 / (fan_in ** 0.5)
    w = jax.random.uniform(kw, (C_out, C_in, Kk, Kk), jnp.float32, -bound, bound)
    b = jax.random.uniform(kb, (C_out,), jnp.float32, -bound, bound)

    out = conv2d_pallas(x, w, b)
    out = jax.block_until_ready(out)

    # Reference check against XLA conv (same NCHW/OIHW convention as PyTorch).
    ref = jax.lax.conv_general_dilated(
        x, w, window_strides=(1, 1), padding="VALID",
        dimension_numbers=("NCHW", "OIHW", "NCHW")) + b[None, :, None, None]

    assert out.shape == (B, C_out, H - Kk + 1, W - Kk + 1), out.shape
    assert jnp.allclose(out, ref, atol=1e-4, rtol=1e-4)
    print("KERNEL_OK")
</pallas_src>

<mosaic_0001>
module attributes {stable_mosaic.version = 11 : i64} {
  func.func @kernel(%arg0: i32, %arg1: memref<32x32xf32, #tpu.memory_space<vmem>>, %arg2: memref<1x32x196xf32, #tpu.memory_space<vmem>>, %arg3: memref<1x32x196xf32, #tpu.memory_space<vmem>>) attributes {dimension_semantics = [#tpu.dimension_semantics<parallel>], iteration_bounds = array<i64: 2>, scalar_prefetch = 0 : i64, scratch_operands = 0 : i64, tpu.core_type = #tpu.core_type<tc>, window_params = [{pipeline_mode = #tpu.pipeline_mode<synchronous>, transform_indices = @transform_0, window_bounds = array<i64: 32, 32>}, {transform_indices = @transform_1, window_bounds = array<i64: 1, 32, 196>}, {transform_indices = @transform_2, window_bounds = array<i64: 1, 32, 196>}]} {
    %c0 = arith.constant 0 : index
    %c0_0 = arith.constant 0 : index
    %0 = vector.load %arg1[%c0, %c0_0] : memref<32x32xf32, #tpu.memory_space<vmem>>, vector<32x32xf32>
    %c0_1 = arith.constant 0 : index
    %c0_2 = arith.constant 0 : index
    %c0_3 = arith.constant 0 : index
    %1 = vector.load %arg2[%c0_1, %c0_2, %c0_3] : memref<1x32x196xf32, #tpu.memory_space<vmem>>, vector<1x32x196xf32>
    %2 = vector.shape_cast %1 : vector<1x32x196xf32> to vector<32x196xf32>
    %cst = arith.constant dense<0.000000e+00> : vector<32x196xf32>
    %3 = tpu.matmul %0, %2, %cst {dimension_numbers = #tpu.dot_dimension_numbers<[1], [0], [0], [1], [0, 0, 1, 1], [], []>} : vector<32x32xf32>, vector<32x196xf32>, vector<32x196xf32> -> vector<32x196xf32>
    %c0_4 = arith.constant 0 : index
    %c0_5 = arith.constant 0 : index
    %c0_6 = arith.constant 0 : index
    %4 = vector.load %arg3[%c0_4, %c0_5, %c0_6] : memref<1x32x196xf32, #tpu.memory_space<vmem>>, vector<1x32x196xf32>
    %5 = vector.shape_cast %4 : vector<1x32x196xf32> to vector<32x196xf32>
    %6 = vector.shape_cast %3 : vector<32x196xf32> to vector<1x32x196xf32>
    tpu.vector_store %arg3[%c0_4, %c0_5, %c0_6], %6 {strides = array<i32>} : memref<1x32x196xf32, #tpu.memory_space<vmem>>, vector<1x32x196xf32>,
    return
  }
  func.func @transform_0(%arg0: i32) -> (i32, i32) {
    %c0_i32 = arith.constant 0 : i32
    %c0_i32_0 = arith.constant 0 : i32
    %c0_i32_1 = arith.constant 0 : i32
    return %c0_i32, %c0_i32_0 : i32, i32
  }
  func.func @transform_1(%arg0: i32) -> (i32, i32, i32) {
    %c0_i32 = arith.constant 0 : i32
    %c0_i32_0 = arith.constant 0 : i32
    %c0_i32_1 = arith.constant 0 : i32
    return %arg0, %c0_i32, %c0_i32_0 : i32, i32, i32
  }
  func.func @transform_2(%arg0: i32) -> (i32, i32, i32) {
    %c0_i32 = arith.constant 0 : i32
    %c0_i32_0 = arith.constant 0 : i32
    %c0_i32_1 = arith.constant 0 : i32
    return %arg0, %c0_i32, %c0_i32_0 : i32, i32, i32
  }
}

</mosaic_0001>

<bundles_post_ra>
// kernel: tpu_custom_call.1
= control target key start
LH: loop header
LB: loop body
LE: loop exit
PB: predicated region body
PF: predicated region fallthrough
CT: control target
= control target key end

     0   :  { %7 = vsyncpa [#allocation3], 0  ;;  %s827_s0 = inlined_call_operand.hbm [shape: f32[32,32], index: 0, kind: input, shape index: {}]   ;;  %s828_s1 = inlined_call_operand.hbm [shape: f32[2,32,196], index: 1, kind: input, shape index: {}]   ;;  %s829_s2 = inlined_call_operand.hbm [shape: f32[2,32,196], index: 2, kind: output, shape index: {}]  }
   0x1   :  { %8 = vsyncpa [#allocation6], 0 }
   0x2   :  { %10 = vsyncpa [#allocation6 + $0x1], 0 }
   0x3   :  { %11 = vsyncpa [#allocation4], 0 }
   0x4   :  { %13 = vsyncpa [#allocation4 + $0x1], 0  ;;  %s642_s9 = smov 0   ;;  %s644_s10 = smov 0  }
   0x5   :  { %s646_s11 = smov 0   ;;  %s648_s12 = smov 0  }
   0x6 LB: > { %s663_s13 = sadd.s32 4294967295, %s615_s12   ;;  %s399_s14 = sadd.s32 4294967294, %s615_s12   ;;  %s615_s12 = sphi %s648_s12, %s851_s12   ;;  %s611_s11 = sphi %s646_s11, %s850_s11   ;;  %s607_s10 = sphi %s644_s10, %s849_s10   ;;  %s603_s9 = sphi %s642_s9, %s848_s9  }
   0x7   : > { %p60_p0 = scmp.ne.s32.totalorder %s607_s10, %s603_s9  ;;  %p830_p1 = scmp.eq.s32.totalorder %s663_s13, 0 }
   0x8   : > { %p90_p3 = scmp.eq.s32.totalorder %s399_s14, 1  ;;  %p400_p5 = scmp.ge.s32.totalorder %s615_s12, 1 }
   0x9   : > { %p672_p4 = por %p830_p1, %p60_p0  ;;  %p97_p7 = scmp.lt.s32.totalorder %s615_s12, 3 }
   0xa   : > { %p677_p6 = por %p90_p3, %p60_p0  ;;  %s617_s18 = smov [#allocation2]  }
   0xb   : > { %s834_s15 = scalar_select %p672_p4, 1, 0 }
   0xc   : > { %s835_s16 = scalar_select %p677_p6, 1, 0 }
   0xd   : > { %p682_p8 = pnand %p400_p5, %p97_p7  ;;  %s109_s19 = sshll.u32 %s617_s18, 4  ;;  %s110_s19 = int_to_ptr.vmem [resolvable:$true] %s109_s19 }
   0xe   : > { %s696_s21 = sadd.s32 1, %s615_s12   ;;  %s47_s22 = sadd.s32 1, %s611_s11 }
   0xf   : > { %s836_s17 = scalar_select %p682_p8, 1, 0 }
  0x10   : > { %p437_p9 = pneg %p682_p8  ;;  %s44_s23 = ssub.s32 %s615_s12, %s696_s21 }
  0x11   : > { %s504_s24 = scalar_lea.vmem %s110_s19, 512  ;;  %p512_p5 = scmp.lt.s32.totalorder %s110_s19, %s110_s19 }
  0x12   : > { %p691_p11 = pnand %p437_p9, %p830_p1  ;;  %p505_p13 = scmp.ne.s32.totalorder %s110_s19, %s504_s24 }
  0x13   : > { %p513_p7 = scmp.lt.s32.totalorder %s504_s24, %s504_s24 }
  0x14   : > { %p495_p12 = pneg %p691_p11 }
  0x15   : > { %p514_p10 = por %p513_p7, %p512_p5 }
  0x16   : > { %p507_p0 = pnand %p505_p13, %p495_p12 }
  0x18   : > { %p508_p3 = pneg %p507_p0 }
  0x1a   : > { %p515_p2 = pnand %p514_p10, %p508_p3 }
  0x1c   : > { %518 = shalt.err (!%p515_p2)
}
  0x1d   : > { %s618_s25 = smov 128   ;;  %s619_s26 = smov 8  }
  0x1e   : > { %440 = dma.hbm_to_vmem [thread:$0]  (!%p691_p11), %s827_s0, 512, %s110_s19, [#allocation3], %s618_s25, %s618_s25, %s619_s26  }
  0x1f   : > { %p45_p9 = scmp.eq.s32.totalorder %s44_s23, 0  ;;  %p54_p12 = scmp.ne.s32.totalorder %s611_s11, %s607_s10 }
  0x20   : > { %p55_p10 = scmp.eq.s32.totalorder %s615_s12, 0  ;;  %p450_p2 = scmp.lt.s32.totalorder %s615_s12, 2 }
  0x21   : > { %s713_s29 = scalar_select %p45_p9, %s611_s11, %s47_s22  }
  0x22   : > { %p56_p13 = por %p55_p10, %p54_p12  ;;  %p838_p0 = scmp.eq.s32.totalorder %s663_s13, 1 }
  0x23   : > { %s123_s3 = sand.u32 1, %s611_s11   ;;  %s419_s4 = sshll.u32 %s615_s12, 10 }
  0x24   : > { %p717_p3 = por %p838_p0, %p54_p12  ;;  %s403_s5 = sshll.u32 %s123_s3, 6 }
  0x25   : > { %s726_s8 = scalar_lea.hbm %s828_s1, %s419_s4  ;;  %s127_s14 = scalar_lea.vmem [#allocation5], %s403_s5 }
  0x26   : > { %s839_s30 = scalar_select %p717_p3, 1, 0 }
  0x27   : > { %s134_s18 = sshll.u32 %s127_s14, 4  ;;  %p728_p11 = pnand %p450_p2, %p56_p13  ;;  %s732_s18 = int_to_ptr.vmem [resolvable:$true] %s134_s18 }
  0x28   : > { %s734_s20 = scalar_lea.sflag [#allocation6], %s123_s3  ;;  %s519_s22 = scalar_lea.hbm %s726_s8, 1024 }
  0x29   : > { %p520_p5 = scmp.ne.s32.totalorder %s726_s8, %s519_s22  ;;  %p521_p7 = pneg %p728_p11 }
  0x2a   : > { %s524_s25 = scalar_lea.hbm %s828_s1, 2048  ;;  %p525_p10 = scmp.lt.s32.totalorder %s726_s8, %s828_s1 }
  0x2b   : > { %p522_p9 = pnand %p521_p7, %p520_p5  ;;  %p526_p2 = scmp.lt.s32.totalorder %s524_s25, %s519_s22 }
  0x2d   : > { %p523_p12 = pneg %p522_p9  ;;  %p527_p13 = por %p526_p2, %p525_p10 }
  0x2f   : > { %p528_p0 = pnand %p527_p13, %p523_p12 }
  0x31   : > { %531 = shalt.err (!%p528_p0)
}
  0x32   : > { %s532_s28 = scalar_lea.vmem %s732_s18, 1024  ;;  %s620_s3 = smov [#allocation5]  }
  0x33   : > { %p533_p1 = scmp.ne.s32.totalorder %s732_s18, %s532_s28  ;;  %s537_s4 = sshll.u32 %s620_s3, 4  ;;  %s538_s4 = int_to_ptr.vmem [resolvable:$false] %s537_s4 }
  0x34   : > { %s539_s5 = scalar_lea.vmem %s538_s4, 2048  ;;  %p540_p9 = scmp.lt.s32.totalorder %s732_s18, %s538_s4 }
  0x35   : > { %p535_p6 = pnand %p533_p1, %p521_p7  ;;  %p541_p3 = scmp.lt.s32.totalorder %s539_s5, %s532_s28 }
  0x37   : > { %p536_p5 = pneg %p535_p6  ;;  %p542_p4 = por %p541_p3, %p540_p9 }
  0x39   : > { %p543_p8 = pnand %p542_p4, %p536_p5 }
  0x3b   : > { %546 = shalt.err (!%p543_p8)
}
  0x3c   : > { %s621_s6 = smov 256   ;;  %s622_s7 = smov 16  }
  0x3d   : > { %444 = dma.hbm_to_vmem [thread:$0]  (!%p728_p11), %s726_s8, 1024, %s732_s18, %s734_s20, %s621_s6, %s621_s6, %s622_s7  }
  0x3e   : > { %p841_p1 = scmp.ne.s32.totalorder %s836_s17, 0 }
  0x3f   : > { %p842_p6 = scmp.eq.s32.totalorder (!%p841_p1), %s663_s13, 0 }
  0x40   : > { %146 = sbr.rel (%p841_p1) target bundleno = 297 (0x129), region = 28 }
  0x45   : > { %590 = dma.done.wait (%p842_p6), [#allocation3], 512   ;;  %p843_p7 = pmov %p842_p6 }
  0x46   : > { %s762_s14 = sand.u32 1, %s607_s10   ;;  %p844_p4 = scmp.ne.s32.totalorder %s834_s15, 0 }
  0x47   : > { %592 = vsyncadd (%p843_p7), [#allocation3], 4294966784  ;;  %s408_s22 = sshll.u32 %s762_s14, 6  ;;  %s153_s23 = scalar_lea.sflag [#allocation6], %s762_s14 }
  0x48   : > { %s156_s8 = scalar_lea.vmem [#allocation5], %s408_s22 }
  0x49   : > { %594 = dma.done.wait (%p844_p4), %s153_s23, 1024  }
  0x4a   : > { %596 = vsyncadd (%p844_p4), %s153_s23, 4294966272  ;;  %v623_v0 = vmov 0.0   ;;  %v188_v1 = vld [vmem:[%s156_s8 + $0x38] sm:$0xff]  ;;  %v187_v2 = vld [vmem:[%s156_s8 + $0x30] sm:$0xff]  ;;  %vm189_vm0 = vcmask 261120   ;;  %s176_s15 = scalar_lea.vmem [#allocation7], %s408_s22 }
  0x4b   : > { %266 = vmatprep.mubr.f32.mxu0 %v623_v0  ;;  %278 = vmatprep.mubr.f32.mxu1 %v623_v0  ;;  %v186_v3 = vld [vmem:[%s156_s8 + $0x28] sm:$0xff]  ;;  %v185_v4 = vld [vmem:[%s156_s8 + $0x20] sm:$0xff]  ;;  %v184_v5 = vld [vmem:[%s156_s8 + $0x18] sm:$0xff]  ;;  %s314_s17 = sshll.u32 %s176_s15, 4  ;;  %vm292_vm1 = vcmask 556032   ;;  %s420_s18 = sshll.u32 %s663_s13, 10  ;;  %s775_s17 = int_to_ptr.vmem [resolvable:$true] %s314_s17 }
  0x4c   : > { %226 = vmatprep.subr.mxu0 %v188_v1  ;;  %421 = vmatprep.subr.mxu1 %v188_v1  ;;  %v183_v6 = vld [vmem:[%s156_s8 + $0x10] sm:$0xff]  ;;  %v182_v7 = vld [vmem:[%s156_s8 + $0x8] sm:$0xff]  ;;  %v181_v8 = vld [vmem:[%s156_s8] sm:$0xff]  ;;  %s782_s24 = scalar_lea.hbm %s829_s2, %s420_s18  ;;  %s301_s13 = scalar_lea.sflag [#allocation4], %s762_s14 }
  0x4d   : > { %227 = vmatpush1.msra.mxu0 %v187_v2  ;;  %425 = vmatpush1.msra.mxu1 %v187_v2  ;;  %v177_v9 = vld [vmem:[#allocation2] sm:$0xff]  ;;  %v179_v10 = vld [vmem:[#allocation2 + $0x10] sm:$0xff]  ;;  %v178_v11 = vld [vmem:[#allocation2 + $0x8] sm:$0xff]  ;;  %s547_s25 = scalar_lea.vmem %s775_s17, 1024  ;;  %p845_p3 = scmp.ne.s32.totalorder %s839_s30, 0 }
  0x4e   : > { %228 = vmatprep.subr.mxu0 %v186_v3  ;;  %422 = vmatprep.subr.mxu1 %v186_v3  ;;  %v180_v12 = vld [vmem:[#allocation2 + $0x18] sm:$0xff]  ;;  %p548_p8 = scmp.ne.s32.totalorder %s775_s17, %s547_s25  ;;  %s624_s26 = smov [#allocation7]  }
  0x4f   : > { %229 = vmatpush1.msra.mxu0 %v185_v4  ;;  %426 = vmatpush1.msra.mxu1 %v185_v4  ;;  %s551_s27 = sshll.u32 %s624_s26, 4  ;;  %s552_s27 = int_to_ptr.vmem [resolvable:$false] %s551_s27 }
  0x50   : > { %230 = vmatprep.subr.mxu0 %v184_v5  ;;  %423 = vmatprep.subr.mxu1 %v184_v5  ;;  %p549_p11 = pnand %p548_p8, %p845_p3  ;;  %s553_s28 = scalar_lea.vmem %s552_s27, 2048 }
  0x51   : > { %231 = vmatpush1.msra.mxu0 %v183_v6  ;;  %427 = vmatpush1.msra.mxu1 %v183_v6  ;;  %p554_p10 = scmp.lt.s32.totalorder %s775_s17, %s552_s27  ;;  %p555_p2 = scmp.lt.s32.totalorder %s553_s28, %s547_s25 }
  0x52   : > { %232 = vmatprep.subr.mxu0 %v182_v7  ;;  %424 = vmatprep.subr.mxu1 %v182_v7  ;;  %p550_p12 = pneg %p549_p11 }
  0x53   : > { %233 = vmatpush1.msra.mxu0 %v181_v8  ;;  %428 = vmatpush1.msra.mxu1 %v181_v8  ;;  %p556_p13 = por %p555_p2, %p554_p10 }
  0x54   : > { %410 = vmatmul.mubr.msk.f32.vlgmr.msra.gmra.mxu0 %vm189_vm0, %v177_v9  ;;  %412 = vmatmul.mubr.msk.f32.vlgmr.msra.gmra.mxu1 %vm189_vm0, %v179_v10 }
  0x55   : > { %272 = vmatprep.mubr.f32.mxu0 %v623_v0  ;;  %284 = vmatprep.mubr.f32.mxu1 %v623_v0  ;;  %p557_p0 = pnand %p556_p13, %p550_p12 }
  0x58   : > { %411 = vmatmul.mubr.msk.f32.gmra.mxu0 %vm189_vm0, %v178_v11  ;;  %413 = vmatmul.mubr.msk.f32.gmra.mxu1 %vm189_vm0, %v180_v12 }
 0x114   : > { %v268_v13 = vpop.f32.mrf.mxu0  ;;  %v280_v14 = vpop.f32.mrf.mxu1 }
 0x115   : > { %291 = vst [vmem:[%s176_s15] sm:$0xff] %v268_v13  ;;  %296 = vst [vmem:[%s176_s15 + $0x20] sm:$0xff] %v280_v14 }
 0x116   : > { %v270_v15 = vpop.f32.mrf.mxu0  ;;  %v282_v16 = vpop.f32.mrf.mxu1 }
 0x117   : > { %293 = vst.msk [vmem:[%s176_s15 + $0x8] sm:$0xff] %vm292_vm1, %v270_v15  ;;  %297 = vst.msk [vmem:[%s176_s15 + $0x28] sm:$0xff] %vm292_vm1, %v282_v16 }
 0x118   : > { %v274_v17 = vpop.f32.mrf.mxu0  ;;  %v286_v18 = vpop.f32.mrf.mxu1 }
 0x119   : > { %294 = vst [vmem:[%s176_s15 + $0x10] sm:$0xff] %v274_v17  ;;  %298 = vst [vmem:[%s176_s15 + $0x30] sm:$0xff] %v286_v18 }
 0x11a   : > { %v276_v19 = vpop.f32.mrf.mxu0  ;;  %v288_v20 = vpop.f32.mrf.mxu1 }
 0x11b   : > { %295 = vst.msk [vmem:[%s176_s15 + $0x18] sm:$0xff] %vm292_vm1, %v276_v19  ;;  %299 = vst.msk [vmem:[%s176_s15 + $0x38] sm:$0xff] %vm292_vm1, %v288_v20 }
 0x11c   : > { %560 = shalt.err (!%p557_p0)
}
 0x11d   : > { %s561_s3 = scalar_lea.hbm %s782_s24, 1024  ;;  %s565_s6 = scalar_lea.hbm %s829_s2, 2048 }
 0x11e   : > { %p562_p5 = scmp.ne.s32.totalorder %s782_s24, %s561_s3  ;;  %p566_p6 = scmp.lt.s32.totalorder %s782_s24, %s829_s2 }
 0x11f   : > { %p567_p7 = scmp.lt.s32.totalorder %s565_s6, %s561_s3 }
 0x120   : > { %p563_p9 = pnand %p562_p5, %p845_p3 }
 0x121   : > { %p568_p4 = por %p567_p7, %p566_p6 }
 0x122   : > { %p564_p1 = pneg %p563_p9 }
 0x124   : > { %p569_p8 = pnand %p568_p4, %p564_p1 }
 0x126   : > { %572 = shalt.err (!%p569_p8)
}
 0x127   : > { %s625_s23 = smov 256   ;;  %s626_s8 = smov 16  }
 0x128   : > { %435 = dma.vmem_to_hbm [thread:$0]  (%p845_p3), %s775_s17, 1024, %s782_s24, %s301_s13, %s625_s23, %s625_s23, %s626_s8  }
 0x129 PF: > { %s329_s15 = sand.u32 1, %s603_s9   ;;  %p846_p11 = scmp.ne.s32.totalorder %s835_s16, 0 }
 0x12a   : > { %p847_p12 = scmp.ge.s32.totalorder %s615_s12, 2  ;;  %s330_s18 = scalar_lea.sflag [#allocation4], %s329_s15 }
 0x12c   : > { %p446_p10 = pnand %p847_p12, %p846_p11 }
 0x12e   : > { %p447_p2 = pneg %p446_p10 }
 0x130   : > { %598 = dma.done.wait (%p447_p2), %s330_s18, 1024  }
 0x131   : > { %600 = vsyncadd (%p447_p2), %s330_s18, 4294966272  ;;  %p16_p13 = scmp.ge.s32.totalorder %s696_s21, 4   ;;  %s848_s9 = smov %s607_s10 }
 0x132   : > { %s849_s10 = smov %s611_s11  ;;  %s850_s11 = smov %s713_s29 }
 0x133   : > { %s851_s12 = smov %s696_s21  ;;  %18 = sbr.rel (!%p16_p13) target bundleno = 6 (0x6), region = 78 }
 0x138   :  { %335 = vsyncpa [#allocation3], 1 }
 0x139   :  { %337 = vsyncpa [#allocation3 + $0x1], 1 }
 0x13a   :  { %338 = vsyncpa [#allocation6], 1 }
 0x13b   :  { %340 = vsyncpa [#allocation6 + $0x1], 1 }
 0x13c   :  { %341 = vsyncpa [#allocation4], 1 }
 0x13d   :  { %343 = vsyncpa [#allocation4 + $0x1], 1 }

</bundles_post_ra>
